<compile_context>
chip_gen: v5e
topology: v5e:2x2
jax: 0.10.0
libtpu: 0.0.40
codegen_flags: <defaults>
</compile_context>

<pallas_src>
import functools

import jax
import jax.numpy as jnp
from jax.experimental import pallas as pl
from jax.experimental.pallas import tpu as pltpu

_NEG = -1e30      # pad value for extra vocab columns (finite, so 0 * _NEG == -0.0)
_LANE = 128
_SUBLANE = 8


def _round_up(x, m):
    return ((x + m - 1) // m) * m


def _bigram_kernel(idx_ref, tgt_ref, table_ref, *out_refs,
                   want_logits, want_loss, n_valid):
    tn = idx_ref.shape[0]
    vp = table_ref.shape[1]

    idx = idx_ref[...]                                        # (tn, 1) int32
    col = jax.lax.broadcasted_iota(jnp.int32, (tn, vp), 1)    # (tn, vp) vocab ids

    # Embedding lookup as one-hot @ table on the MXU (exact for 0/1 weights).
    onehot = (col == idx).astype(jnp.float32)                 # (tn, vp)
    logits = jnp.dot(onehot, table_ref[...],
                     preferred_element_type=jnp.float32)      # (tn, vp)

    o = 0
    if want_logits:
        out_refs[o][...] = logits                             # lane-dense (tn, 128) store
        o += 1

    if want_loss:
        loss_ref = out_refs[o]
        tgt = tgt_ref[...]                                    # (tn, 1) int32
        # Row-wise logsumexp over the (padded) vocab axis; padded columns hold
        # _NEG so exp() underflows to exactly 0 and they do not bias the LSE.
        m = jnp.max(logits, axis=-1, keepdims=True)           # (tn, 1)
        lse = m + jnp.log(jnp.sum(jnp.exp(logits - m), axis=-1, keepdims=True))
        # Select the target logit with a mask instead of a second one-hot matmul.
        tgt_logit = jnp.sum(jnp.where(col == tgt, logits, 0.0),
                            axis=-1, keepdims=True)           # (tn, 1)
        nll = lse - tgt_logit                                 # (tn, 1)
        # Mask padded tail rows (global row id >= true N) out of the partial sum.
        row = pl.program_id(0) * tn + jax.lax.broadcasted_iota(jnp.int32, (tn, 1), 0)
        nll = jnp.where(row < n_valid, nll, 0.0)
        loss_ref[...] = jnp.broadcast_to(jnp.sum(nll), loss_ref.shape)


def _bigram_pallas(idx_flat, table, targets_flat, *, want_logits):
    n = int(idx_flat.shape[0])
    v = int(table.shape[0])
    vp = _round_up(max(v, _LANE), _LANE)
    tn = min(512, _round_up(n, _SUBLANE))
    np_ = _round_up(n, tn)
    num_tiles = np_ // tn
    want_loss = targets_flat is not None

    # Pad the embedding table to (vp, vp); padded columns get a large finite
    # negative value so they drop out of the logsumexp. Padded rows (token ids
    # >= v) are never indexed.
    table_p = jnp.full((vp, vp), _NEG, dtype=jnp.float32)
    table_p = table_p.at[:v, :v].set(table.astype(jnp.float32))

    idx_p = jnp.pad(idx_flat.astype(jnp.int32), (0, np_ - n)).reshape(np_, 1)
    if want_loss:
        tgt_p = jnp.pad(targets_flat.astype(jnp.int32), (0, np_ - n)).reshape(np_, 1)
    else:
        tgt_p = jnp.zeros((np_, 1), jnp.int32)

    out_shape = []
    out_specs = []
    if want_logits:
        out_shape.append(jax.ShapeDtypeStruct((np_, vp), jnp.float32))
        out_specs.append(pl.BlockSpec((tn, vp), lambda i: (i, 0)))
    if want_loss:
        out_shape.append(jax.ShapeDtypeStruct((num_tiles, _SUBLANE, _LANE), jnp.float32))
        out_specs.append(pl.BlockSpec((1, _SUBLANE, _LANE), lambda i: (i, 0, 0)))

    kernel = functools.partial(_bigram_kernel, want_logits=want_logits,
                               want_loss=want_loss, n_valid=n)

    outs = pl.pallas_call(
        kernel,
        out_shape=tuple(out_shape),
        grid=(num_tiles,),
        in_specs=[
            pl.BlockSpec((tn, 1), lambda i: (i, 0)),    # idx (thin column, tiny traffic)
            pl.BlockSpec((tn, 1), lambda i: (i, 0)),    # targets
            pl.BlockSpec((vp, vp), lambda i: (0, 0)),   # table, resident across the grid
        ],
        out_specs=tuple(out_specs),
        compiler_params=pltpu.CompilerParams(
            dimension_semantics=("parallel",),          # tiles are independent -> megacore
            vmem_limit_bytes=32 * 1024 * 1024,
        ),
    )(idx_p, tgt_p, table_p)

    if not isinstance(outs, (tuple, list)):
        outs = (outs,)

    o = 0
    logits_out = None
    loss_out = None
    if want_logits:
        logits_out = outs[o][:n, :v]
        o += 1
    if want_loss:
        loss_out = jnp.sum(outs[o][:, 0, 0]) / jnp.float32(n)
    return logits_out, loss_out


def bigram_forward(idx, table, targets=None):
    """Pallas implementation of BigramLanguageModel.forward.

    Returns (logits, loss). If targets is None, logits has shape (B, T, V) and
    loss is None; otherwise logits has shape (B*T, V) (matching the PyTorch view)
    and loss is a scalar float32.
    """
    b, t = idx.shape
    v = table.shape[0]
    n = b * t
    tgt_flat = None if targets is None else targets.reshape(n)
    logits_flat, loss = _bigram_pallas(idx.reshape(n), table, tgt_flat,
                                       want_logits=True)
    if targets is None:
        return logits_flat.reshape(b, t, v), None
    return logits_flat, loss


def bigram_loss(idx, table, targets):
    """Training-step helper: cross-entropy only, skips the (N, V) logits writeback."""
    n = idx.shape[0] * idx.shape[1]
    _, loss = _bigram_pallas(idx.reshape(n), table, targets.reshape(n),
                             want_logits=False)
    return loss


def _reference_forward(idx, table, targets=None):
    """Pure-JAX reference for correctness checking."""
    logits = table[idx]                      # (B, T, V)
    if targets is None:
        return logits, None
    b, t, v = logits.shape
    lf = logits.reshape(b * t, v)
    tf = targets.reshape(b * t)
    logp = jax.nn.log_softmax(lf, axis=-1)
    loss = -jnp.mean(logp[jnp.arange(b * t), tf])
    return lf, loss


if __name__ == "__main__":
    vocab_size = 65   # e.g. tiny-shakespeare char vocab
    B, T = 2, 8

    key = jax.random.PRNGKey(0)
    k_table, k_idx, k_tgt = jax.random.split(key, 3)

    # nn.Embedding default init: N(0, 1)
    table = jax.random.normal(k_table, (vocab_size, vocab_size), dtype=jnp.float32)
    idx = jax.random.randint(k_idx, (B, T), 0, vocab_size, dtype=jnp.int32)
    targets = jax.random.randint(k_tgt, (B, T), 0, vocab_size, dtype=jnp.int32)

    # With targets: flattened (B*T, V) logits + scalar loss (PyTorch semantics).
    logits, loss = bigram_forward(idx, table, targets)
    logits = jax.block_until_ready(logits)
    loss = jax.block_until_ready(loss)

    # Without targets: (B, T, V) logits, loss None (CE math skipped in-kernel).
    logits_nt, loss_nt = bigram_forward(idx, table, None)
    logits_nt = jax.block_until_ready(logits_nt)

    # Loss-only path (skips the logits HBM writeback entirely).
    loss_only = jax.block_until_ready(bigram_loss(idx, table, targets))

    ref_logits, ref_loss = _reference_forward(idx, table, targets)

    assert logits.shape == (B * T, vocab_size)
    assert logits_nt.shape == (B, T, vocab_size)
    assert loss_nt is None
    assert jnp.allclose(logits, ref_logits, atol=1e-5)
    assert jnp.allclose(logits_nt.reshape(B * T, vocab_size), ref_logits, atol=1e-5)
    assert jnp.allclose(loss, ref_loss, atol=1e-5)
    assert jnp.allclose(loss_only, ref_loss, atol=1e-5)

    # Multi-tile path with a ragged tail (exercises N tiling + tail masking).
    B2, T2 = 4, 300                     # N = 1200 -> 3 tiles of 512, masked tail
    k_idx2, k_tgt2 = jax.random.split(jax.random.PRNGKey(1))
    idx2 = jax.random.randint(k_idx2, (B2, T2), 0, vocab_size, dtype=jnp.int32)
    targets2 = jax.random.randint(k_tgt2, (B2, T2), 0, vocab_size, dtype=jnp.int32)
    logits2, loss2 = bigram_forward(idx2, table, targets2)
    logits2 = jax.block_until_ready(logits2)
    loss2 = jax.block_until_ready(loss2)
    ref_logits2, ref_loss2 = _reference_forward(idx2, table, targets2)
    assert jnp.allclose(logits2, ref_logits2, atol=1e-5)
    assert jnp.allclose(loss2, ref_loss2, atol=1e-5)

    print("KERNEL_OK")
</pallas_src>

<mosaic_0001>
module attributes {stable_mosaic.version = 11 : i64} {
  func.func @_bigram_kernel(%arg0: i32, %arg1: memref<16x1xi32, #tpu.memory_space<vmem>>, %arg2: memref<16x1xi32, #tpu.memory_space<vmem>>, %arg3: memref<128x128xf32, #tpu.memory_space<vmem>>, %arg4: memref<16x128xf32, #tpu.memory_space<vmem>>, %arg5: memref<1x8x128xf32, #tpu.memory_space<vmem>>) attributes {dimension_semantics = [#tpu.dimension_semantics<parallel>], iteration_bounds = array<i64: 1>, scalar_prefetch = 0 : i64, scratch_operands = 0 : i64, tpu.core_type = #tpu.core_type<tc>, window_params = [{transform_indices = @transform_0, window_bounds = array<i64: 16, 1>}, {transform_indices = @transform_1, window_bounds = array<i64: 16, 1>}, {pipeline_mode = #tpu.pipeline_mode<synchronous>, transform_indices = @transform_2, window_bounds = array<i64: 128, 128>}, {transform_indices = @transform_3, window_bounds = array<i64: 16, 128>}, {transform_indices = @transform_4, window_bounds = array<i64: 1, 8, 128>}]} {
    %c0 = arith.constant 0 : index
    %c0_0 = arith.constant 0 : index
    %0 = vector.load %arg1[%c0, %c0_0] : memref<16x1xi32, #tpu.memory_space<vmem>>, vector<16x1xi32>
    %1 = tpu.iota {dimensions = array<i32: 1>} : vector<16x128xi32>
    %2 = vector.broadcast %0 : vector<16x1xi32> to vector<16x128xi32>
    %3 = arith.cmpi eq, %1, %2 : vector<16x128xi32>
    %4 = arith.extui %3 : vector<16x128xi1> to vector<16x128xi32>
    %5 = arith.sitofp %4 : vector<16x128xi32> to vector<16x128xf32>
    %c0_1 = arith.constant 0 : index
    %c0_2 = arith.constant 0 : index
    %6 = vector.load %arg3[%c0_1, %c0_2] : memref<128x128xf32, #tpu.memory_space<vmem>>, vector<128x128xf32>
    %cst = arith.constant dense<0.000000e+00> : vector<16x128xf32>
    %7 = tpu.matmul %5, %6, %cst {dimension_numbers = #tpu.dot_dimension_numbers<[1], [0], [0], [1], [0, 0, 1, 1], [], []>} : vector<16x128xf32>, vector<128x128xf32>, vector<16x128xf32> -> vector<16x128xf32>
    %c0_3 = arith.constant 0 : index
    %c0_4 = arith.constant 0 : index
    %8 = vector.load %arg4[%c0_3, %c0_4] : memref<16x128xf32, #tpu.memory_space<vmem>>, vector<16x128xf32>
    tpu.vector_store %arg4[%c0_3, %c0_4], %7 {strides = array<i32>} : memref<16x128xf32, #tpu.memory_space<vmem>>, vector<16x128xf32>,
    %c0_5 = arith.constant 0 : index
    %c0_6 = arith.constant 0 : index
    %9 = vector.load %arg2[%c0_5, %c0_6] : memref<16x1xi32, #tpu.memory_space<vmem>>, vector<16x1xi32>
    %cst_7 = arith.constant dense<0xFF800000> : vector<16xf32>
    %10 = vector.multi_reduction <maximumf>, %7, %cst_7 [1] : vector<16x128xf32> to vector<16xf32>
    %11 = vector.shape_cast %10 : vector<16xf32> to vector<16x1xf32>
    %12 = vector.broadcast %11 : vector<16x1xf32> to vector<16x128xf32>
    %13 = arith.subf %7, %12 : vector<16x128xf32>
    %14 = math.exp %13 : vector<16x128xf32>
    %cst_8 = arith.constant dense<0.000000e+00> : vector<16xf32>
    %15 = vector.multi_reduction <add>, %14, %cst_8 [1] : vector<16x128xf32> to vector<16xf32>
    %16 = vector.shape_cast %15 : vector<16xf32> to vector<16x1xf32>
    %17 = math.log %16 : vector<16x1xf32>
    %18 = arith.addf %11, %17 : vector<16x1xf32>
    %19 = vector.broadcast %9 : vector<16x1xi32> to vector<16x128xi32>
    %20 = arith.cmpi eq, %1, %19 : vector<16x128xi32>
    %cst_9 = arith.constant 0.000000e+00 : f32
    %21 = vector.broadcast %cst_9 : f32 to vector<16x128xf32>
    %22 = arith.select %20, %7, %21 : vector<16x128xi1>, vector<16x128xf32>
    %cst_10 = arith.constant dense<0.000000e+00> : vector<16xf32>
    %23 = vector.multi_reduction <add>, %22, %cst_10 [1] : vector<16x128xf32> to vector<16xf32>
    %24 = vector.shape_cast %23 : vector<16xf32> to vector<16x1xf32>
    %25 = arith.subf %18, %24 : vector<16x1xf32>
    %c16_i32 = arith.constant 16 : i32
    %26 = arith.muli %arg0, %c16_i32 : i32
    %27 = tpu.iota {dimensions = array<i32: 0>} : vector<16x1xi32>
    %28 = vector.broadcast %26 : i32 to vector<16x1xi32>
    %29 = arith.addi %28, %27 : vector<16x1xi32>
    %c16_i32_11 = arith.constant 16 : i32
    %30 = vector.broadcast %c16_i32_11 : i32 to vector<16x1xi32>
    %31 = arith.cmpi slt, %29, %30 : vector<16x1xi32>
    %cst_12 = arith.constant 0.000000e+00 : f32
    %32 = vector.broadcast %cst_12 : f32 to vector<16x1xf32>
    %33 = arith.select %31, %25, %32 : vector<16x1xi1>, vector<16x1xf32>
    %34 = vector.shape_cast %33 : vector<16x1xf32> to vector<1x16x1xf32>
    %cst_13 = arith.constant dense<0.000000e+00> : vector<1xf32>
    %35 = vector.multi_reduction <add>, %34, %cst_13 [1, 2] : vector<1x16x1xf32> to vector<1xf32>
    %36 = vector.shape_cast %35 : vector<1xf32> to vector<1x1x1xf32>
    %37 = vector.extract %36[0, 0, 0] : f32 from vector<1x1x1xf32>
    %38 = vector.broadcast %37 : f32 to vector<1x8x128xf32>
    %c0_14 = arith.constant 0 : index
    %c0_15 = arith.constant 0 : index
    %c0_16 = arith.constant 0 : index
    %39 = vector.load %arg5[%c0_14, %c0_15, %c0_16] : memref<1x8x128xf32, #tpu.memory_space<vmem>>, vector<1x8x128xf32>
    tpu.vector_store %arg5[%c0_14, %c0_15, %c0_16], %38 {strides = array<i32>} : memref<1x8x128xf32, #tpu.memory_space<vmem>>, vector<1x8x128xf32>,
    return
  }
  func.func @transform_0(%arg0: i32) -> (i32, i32) {
    %c0_i32 = arith.constant 0 : i32
    %c0_i32_0 = arith.constant 0 : i32
    return %arg0, %c0_i32 : i32, i32
  }
  func.func @transform_1(%arg0: i32) -> (i32, i32) {
    %c0_i32 = arith.constant 0 : i32
    %c0_i32_0 = arith.constant 0 : i32
    return %arg0, %c0_i32 : i32, i32
  }
  func.func @transform_2(%arg0: i32) -> (i32, i32) {
    %c0_i32 = arith.constant 0 : i32
    %c0_i32_0 = arith.constant 0 : i32
    %c0_i32_1 = arith.constant 0 : i32
    return %c0_i32, %c0_i32_0 : i32, i32
  }
  func.func @transform_3(%arg0: i32) -> (i32, i32) {
    %c0_i32 = arith.constant 0 : i32
    %c0_i32_0 = arith.constant 0 : i32
    return %arg0, %c0_i32 : i32, i32
  }
  func.func @transform_4(%arg0: i32) -> (i32, i32, i32) {
    %c0_i32 = arith.constant 0 : i32
    %c0_i32_0 = arith.constant 0 : i32
    %c0_i32_1 = arith.constant 0 : i32
    return %arg0, %c0_i32, %c0_i32_0 : i32, i32, i32
  }
}

</mosaic_0001>

<bundles_post_ra>
// kernel: tpu_custom_call.1
= control target key start
LH: loop header
LB: loop body
LE: loop exit
PB: predicated region body
PF: predicated region fallthrough
CT: control target
= control target key end

     0   :  { %10 = vsyncpa [#allocation3], 0  ;;  %s366_s0 = inlined_call_operand.vmem [shape: s32[16,1], index: 0, kind: input, shape index: {}]   ;;  %s367_s1 = inlined_call_operand.vmem [shape: s32[16,1], index: 1, kind: input, shape index: {}]   ;;  %s368_s2 = inlined_call_operand.hbm [shape: f32[128,128], index: 2, kind: input, shape index: {}]   ;;  %s369_s3 = inlined_call_operand.hbm [shape: f32[16,128], index: 3, kind: output, shape index: {0}]   ;;  %s370_s4 = inlined_call_operand.hbm [shape: f32[1,8,128], index: 4, kind: output, shape index: {1}]  }
   0x1   :  { %11 = vsyncpa [#allocation4], 0 }
   0x2   :  { %12 = vsyncpa [#allocation7], 0  ;;  %s21_s17 = sshll.u32 %s368_s2, 4  ;;  %s307_s18 = smov [#allocation2]   ;;  %s22_s17 = int_to_ptr.hbm [resolvable:$true] %s21_s17 }
   0x3   :  { %s23_s19 = sshll.u32 %s307_s18, 4  ;;  %s308_s20 = smov 128   ;;  %s24_s19 = int_to_ptr.vmem [resolvable:$true] %s23_s19 }
   0x4   :  { %s309_s21 = smov 8  }
   0x5   :  { %29 = dma.hbm_to_vmem [thread:$0]  %s22_s17, 2048, %s24_s19, [#allocation3], %s308_s20, %s308_s20, %s309_s21  }
   0x6   :  { %301 = dma.done.wait [#allocation3], 2048  }
   0x7   :  { %302 = vsyncadd [#allocation3], 4294965248  ;;  %v310_v0 = vmov 0   ;;  %v34_v1 = vld [vmem:[%s366_s0] sm:$0xff]  ;;  %v65_v2 = vld [vmem:[#allocation2 + $0x78] sm:$0xff]  ;;  %v36_v21 = vlaneseq  ;;  %v311_v24 = vmov 1.0  }
   0x8   :  { %219 = vset.pattern.permute.xlu0 %v310_v0  ;;  %220 = vset.pattern.permute.xlu2 %v310_v0  ;;  %v64_v3 = vld [vmem:[#allocation2 + $0x70] sm:$0xff]  ;;  %v63_v4 = vld [vmem:[#allocation2 + $0x68] sm:$0xff]  ;;  %v62_v5 = vld [vmem:[#allocation2 + $0x60] sm:$0xff]  ;;  %vm140_vm4 = vcmask 7168   ;;  %s161_s5 = sshll.u32 %s369_s3, 4  ;;  %s313_s6 = smov [#allocation6]   ;;  %s162_s5 = int_to_ptr.hbm [resolvable:$true] %s161_s5 }
   0x9   :  { %39 = vperm.xlu0 %219, %v34_v1   ;;  %66 = vmatpush.msra.mxu0 %v65_v2  ;;  %v35_v6 = vld [vmem:[%s366_s0 + $0x8] sm:$0xff]  ;;  %v61_v7 = vld [vmem:[#allocation2 + $0x58] sm:$0xff]  ;;  %v60_v8 = vld [vmem:[#allocation2 + $0x50] sm:$0xff]  ;;  %v37_v22 = vand.u32 127, %v36_v21  ;;  %s173_s7 = sshll.u32 %s313_s6, 4  ;;  %s175_s3 = sshll.u32 %s370_s4, 4  ;;  %s174_s7 = int_to_ptr.vmem [resolvable:$true] %s173_s7  ;;  %s176_s3 = int_to_ptr.hbm [resolvable:$true] %s175_s3 }
   0xa   :  { %194 = vmatpush.msra.mxu1 %v65_v2  ;;  %v59_v9 = vld [vmem:[#allocation2 + $0x48] sm:$0xff]  ;;  %v58_v10 = vld [vmem:[#allocation2 + $0x40] sm:$0xff]  ;;  %v57_v11 = vld [vmem:[#allocation2 + $0x38] sm:$0xff] }
   0xb   :  { %67 = vmatpush.msra.mxu0 %v64_v3  ;;  %v56_v12 = vld [vmem:[#allocation2 + $0x30] sm:$0xff]  ;;  %v55_v13 = vld [vmem:[#allocation2 + $0x28] sm:$0xff]  ;;  %v54_v14 = vld [vmem:[#allocation2 + $0x20] sm:$0xff] }
   0xc   :  { %195 = vmatpush.msra.mxu1 %v64_v3  ;;  %v53_v15 = vld [vmem:[#allocation2 + $0x18] sm:$0xff]  ;;  %v52_v16 = vld [vmem:[#allocation2 + $0x10] sm:$0xff]  ;;  %v51_v17 = vld [vmem:[#allocation2 + $0x8] sm:$0xff] }
   0xd   :  { %68 = vmatpush.msra.mxu0 %v63_v4  ;;  %v50_v18 = vld [vmem:[#allocation2] sm:$0xff]  ;;  %v92_v20 = vld [vmem:[%s367_s1 + $0x8] sm:$0xff] }
   0xe   :  { %196 = vmatpush.msra.mxu1 %v63_v4  ;;  %v91_v19 = vld [vmem:[%s367_s1] sm:$0xff]  ;;  %s312_s1 = smov [#allocation5]  }
   0xf   :  { %69 = vmatpush.msra.mxu0 %v62_v5  ;;  %114 = vperm.xlu2 %220, %v91_v19   ;;  %s159_s28 = sshll.u32 %s312_s1, 4  ;;  %s160_s28 = int_to_ptr.vmem [resolvable:$true] %s159_s28 }
  0x10   :  { %197 = vmatpush.msra.mxu1 %v62_v5 }
  0x11   :  { %42 = vperm.xlu0 %219, %v35_v6   ;;  %70 = vmatpush.msra.mxu0 %v61_v7 }
  0x12   :  { %198 = vmatpush.msra.mxu1 %v61_v7 }
  0x13   :  { %71 = vmatpush.msra.mxu0 %v60_v8 }
  0x14   :  { %199 = vmatpush.msra.mxu1 %v60_v8 }
  0x15   :  { %72 = vmatpush.msra.mxu0 %v59_v9 }
  0x16   :  { %200 = vmatpush.msra.mxu1 %v59_v9 }
  0x17   :  { %73 = vmatpush.msra.mxu0 %v58_v10  ;;  %117 = vperm.xlu2 %220, %v92_v20  }
  0x18   :  { %201 = vmatpush.msra.mxu1 %v58_v10 }
  0x19   :  { %74 = vmatpush.msra.mxu0 %v57_v11 }
  0x1a   :  { %202 = vmatpush.msra.mxu1 %v57_v11 }
  0x1b   :  { %75 = vmatpush.msra.mxu0 %v56_v12 }
  0x1c   :  { %203 = vmatpush.msra.mxu1 %v56_v12 }
  0x1d   :  { %76 = vmatpush.msra.mxu0 %v55_v13 }
  0x1e   :  { %204 = vmatpush.msra.mxu1 %v55_v13 }
  0x1f   :  { %77 = vmatpush.msra.mxu0 %v54_v14 }
  0x20   :  { %205 = vmatpush.msra.mxu1 %v54_v14 }
  0x21   :  { %78 = vmatpush.msra.mxu0 %v53_v15 }
  0x22   :  { %206 = vmatpush.msra.mxu1 %v53_v15 }
  0x23   :  { %79 = vmatpush.msra.mxu0 %v52_v16 }
  0x24   :  { %207 = vmatpush.msra.mxu1 %v52_v16 }
  0x25   :  { %80 = vmatpush.msra.mxu0 %v51_v17 }
  0x26   :  { %208 = vmatpush.msra.mxu1 %v51_v17 }
  0x27   :  { %81 = vmatpush.msra.mxu0 %v50_v18 }
  0x28   :  { %209 = vmatpush.msra.mxu1 %v50_v18 }
  0x69   :  { %v115_v26 = vpop.permute.xlu2 %114 }
  0x6a   :  { %vm119_vm2 = vcmp.eq.s32.totalorder %v37_v22, %v115_v26 }
  0x71   :  { %v118_v38 = vpop.permute.xlu2 %117 }
  0x72   :  { %vm120_vm3 = vcmp.eq.s32.totalorder %v37_v22, %v118_v38 }
  0x7b   :  { %v40_v23 = vpop.permute.xlu0 %39 }
  0x7c   :  { %vm44_vm0 = vcmp.eq.s32.totalorder %v37_v22, %v40_v23 }
  0x7d   :  { %192 = vmatmul.msk.f32.vlgmr.msra.gmra.mxu0 %vm44_vm0, %v311_v24 }
  0x83   :  { %v43_v25 = vpop.permute.xlu0 %42 }
  0x84   :  { %vm45_vm1 = vcmp.eq.s32.totalorder %v37_v22, %v43_v25 }
  0x85   :  { %193 = vmatmul.msk.f32.vlgmr.msra.gmra.mxu1 %vm45_vm1, %v311_v24 }
  0xfa   :  { %v83_v27 = vpop.f32.mrf.mxu0 }
  0xfb   :  { %89 = vst [vmem:[#allocation5] sm:$0xff] %v83_v27  ;;  %93 = vmax.xlane.f32.xlu1 %v83_v27  ;;  %v121_v28 = vsel %vm119_vm2, %v83_v27, 0.0 }
  0xfc   :  { %123 = vadd.xlane.f32.xlu2 %v121_v28 }
 0x102   :  { %v86_v29 = vpop.f32.mrf.mxu1 }
 0x103   :  { %90 = vst [vmem:[#allocation5 + $0x8] sm:$0xff] %v86_v29  ;;  %95 = vmax.xlane.f32.xlu1 %v86_v29  ;;  %v122_v39 = vsel %vm120_vm3, %v86_v29, 0.0 }
 0x104   :  { %167 = dma.vmem_to_hbm [thread:$0]  %s160_s28, 256, %s162_s5, [#allocation4], %s308_s20, %s308_s20, %s309_s21  }
 0x16e   :  { %v94_v30 = vpop.xlane.xlu1 %93 }
 0x16f   :  { %v97_v31 = vsub.f32 %v83_v27, %v94_v30  ;;  %v124_v47 = vpop.xlane.xlu2 %123 }
 0x171   :  { %v99_v32 = vmul.f32 1.442695, %v97_v31 }
 0x173   :  { %221 = vpow2.f32 %v99_v32 }
 0x176   :  { %v96_v33 = vpop.xlane.xlu1 %95 }
 0x177   :  { %v98_v34 = vsub.f32 %v86_v29, %v96_v33 }
 0x179   :  { %v222_v35 = vpop.eup %221  ;;  %v101_v36 = vmul.f32 1.442695, %v98_v34 }
 0x17a   :  { %103 = vadd.xlane.f32.xlu0 %v222_v35 }
 0x17b   :  { %223 = vpow2.f32 %v101_v36 }
 0x181   :  { %v224_v37 = vpop.eup %223 }
 0x182   :  { %105 = vadd.xlane.f32.xlu1 %v224_v37 }
 0x18a   :  { %125 = vadd.xlane.f32.xlu1 %v122_v39 }
 0x1ed   :  { %v104_v40 = vpop.xlane.xlu0 %103 }
 0x1ee   :  { %225 = vlog2.f32 %v104_v40 }
 0x1f4   :  { %v226_v41 = vpop.eup %225 }
 0x1f5   :  { %v106_v42 = vpop.xlane.xlu1 %105  ;;  %v108_v43 = vmul.f32 0.6931472, %v226_v41 }
 0x1f6   :  { %227 = vlog2.f32 %v106_v42 }
 0x1f7   :  { %v111_v44 = vadd.f32 %v108_v43, %v94_v30 }
 0x1f9   :  { %v127_v49 = vsub.f32 %v111_v44, %v124_v47 }
 0x1fb   :  { %v141_v52 = vsel %vm140_vm4, %v127_v49, 0.0 }
 0x1fc   :  { %v228_v45 = vpop.eup %227 }
 0x1fd   :  { %v110_v46 = vmul.f32 0.6931472, %v228_v45  ;;  %v126_v50 = vpop.xlane.xlu1 %125 }
 0x1ff   :  { %v112_v48 = vadd.f32 %v110_v46, %v96_v33 }
 0x201   :  { %v128_v51 = vsub.f32 %v112_v48, %v126_v50 }
 0x203   :  { %v142_v53 = vsel %vm140_vm4, %v128_v51, 0.0 }
 0x204   :  { %v143_v54 = vadd.f32 %v142_v53, %v141_v52 }
 0x206   :  { %144 = vadd.xlane.f32.xlu1 %v143_v54 }
 0x279   :  { %v145_v55 = vpop.xlane.xlu1 %144 }
 0x27a   :  { %v146_v56 = vrot.slane %v145_v55, 4 }
 0x27c   :  { %v147_v57 = vadd.f32 %v146_v56, %v145_v55 }
 0x27e   :  { %v148_v58 = vrot.slane %v147_v57, 2 }
 0x280   :  { %v149_v59 = vadd.f32 %v148_v58, %v147_v57 }
 0x282   :  { %v150_v60 = vrot.slane %v149_v59, 1 }
 0x284   :  { %v151_v61 = vadd.f32 %v150_v60, %v149_v59 }
 0x286   :  { %210 = vpush %v151_v61 }
 0x2b7   :  { %s211_s10 = spop %210 }
 0x2b8   :  { %v153_v62 = vstv %s211_s10 }
 0x2b9   :  { %154 = vst [vmem:[#allocation6] sm:$0xff] %v153_v62 }
 0x2ba   :  { %178 = dma.vmem_to_hbm [thread:$0]  %s174_s7, 128, %s176_s3, [#allocation7]  }
 0x2bb   :  { %303 = dma.done.wait [#allocation4], 256  }
 0x2bc   :  { %304 = vsyncadd [#allocation4], 4294967040 }
 0x2bd   :  { %305 = dma.done.wait [#allocation7], 128  }
 0x2be   :  { %306 = vsyncadd [#allocation7], 4294967168 }
 0x2bf   :  { %187 = vsyncpa [#allocation3], 1 }
 0x2c0   :  { %188 = vsyncpa [#allocation4], 1 }
 0x2c1   :  { %189 = vsyncpa [#allocation7], 1 }

</bundles_post_ra>
